<compile_context>
chip_gen: v7x
topology: tpu7x:2x2x1
jax: 0.10.0
libtpu: 0.0.40
codegen_flags: <defaults>
</compile_context>

<pallas_src>
import functools
import math

import jax
import jax.numpy as jnp
from jax.experimental import pallas as pl
from jax.experimental.pallas import tpu as pltpu


# ----------------------------- phase 1: gate ---------------------------------
def _gate_kernel(img_re_ref, img_im_ref, p_re_ref, p_im_ref, wt_ref, b_ref, gate_ref):
    """One grid step handles a whole (BB, N, C) batch chunk end-to-end:
       real = Re(img * p); pooled = mean_n(real); gate = pooled @ Wt + b."""
    real = img_re_ref[...] * p_re_ref[...] - img_im_ref[...] * p_im_ref[...]   # (BB, N, C)
    pooled = jnp.mean(real, axis=1)                                            # (BB, C)
    gate_ref[...] = (
        jnp.dot(pooled, wt_ref[...], preferred_element_type=jnp.float32)
        + b_ref[...])                                                           # (BB, C)


# ----------------------------- phase 2: apply ---------------------------------
def _apply_gate_kernel(n_t, gate_ref, text_ref, out_ref):
    """Flattened grid (B * n_t,).  The full gate stays resident in VMEM; each step
    multiplies one lane-dense (TT, CL) text tile by its batch's gate row."""
    b = pl.program_id(0) // n_t
    g = gate_ref[pl.ds(b, 1), :]                  # (1, CL)
    out_ref[...] = text_ref[...] * g              # (TT, CL) * (1, CL)


def text_frequency_selection(text, img_re, img_im, p_re, p_im, conv_w, conv_b):
    """text: (B,T,C) f32; img_re/img_im: (B,N,C) f32; p_re/p_im: (N,C) f32;
    conv_w: (C_out, C_in) f32 (Conv1d kernel-1 weight squeezed); conv_b: (C,) f32."""
    B, T, C = text.shape
    _, N, _ = img_re.shape

    wt = conv_w.T.astype(jnp.float32)              # (C_in, C_out): pooled @ Wt
    b2 = conv_b.reshape(1, C).astype(jnp.float32)
    p_re3 = p_re.reshape(1, N, C).astype(jnp.float32)
    p_im3 = p_im.reshape(1, N, C).astype(jnp.float32)

    # Generation-aware VMEM budgets (v5e/v6e: 128 MiB physical; v7x: 64 MiB per TC).
    try:
        vmem_cap = pltpu.get_tpu_info().vmem_capacity_bytes
    except Exception:
        vmem_cap = 64 * 1024 * 1024                # conservative fallback
    if vmem_cap >= 128 * 1024 * 1024:              # v5e / v6e
        tile_budget_bytes = 16 * 1024 * 1024
        vmem_limit_bytes = 96 * 1024 * 1024
    else:                                           # v7x (and fallback)
        tile_budget_bytes = 8 * 1024 * 1024
        vmem_limit_bytes = 48 * 1024 * 1024

    # ------------- phase 1: gate[b, c] = (pooled @ Wt + b), shape (B, C) -------------
    # Chunk B so one step's img planes stay <= ~8 MiB each; usually a single grid step.
    per_row_bytes = N * C * 4
    bb_max = max(1, (8 * 1024 * 1024) // per_row_bytes)
    if B <= bb_max:
        BB = B
    else:
        BB = max(8, (min(B, bb_max) // 8) * 8)     # 8-aligned chunk when splitting B
    n_b = pl.cdiv(B, BB)

    gate = pl.pallas_call(
        _gate_kernel,
        out_shape=jax.ShapeDtypeStruct((B, C), jnp.float32),
        grid_spec=pltpu.PrefetchScalarGridSpec(
            num_scalar_prefetch=0,
            grid=(n_b,),
            in_specs=[
                pl.BlockSpec((BB, N, C), lambda i: (i, 0, 0)),    # img_re
                pl.BlockSpec((BB, N, C), lambda i: (i, 0, 0)),    # img_im
                pl.BlockSpec((1, N, C), lambda i: (0, 0, 0)),     # p_re
                pl.BlockSpec((1, N, C), lambda i: (0, 0, 0)),     # p_im
                pl.BlockSpec((C, C), lambda i: (0, 0)),           # Wt
                pl.BlockSpec((1, C), lambda i: (0, 0)),           # bias
            ],
            out_specs=pl.BlockSpec((BB, C), lambda i: (i, 0)),
        ),
        compiler_params=pltpu.CompilerParams(
            dimension_semantics=("parallel",),
            vmem_limit_bytes=vmem_limit_bytes),
        cost_estimate=pl.CostEstimate(
            flops=4 * B * N * C + 2 * B * C * C,
            transcendentals=0,
            bytes_accessed=4 * (2 * B * N * C + 2 * N * C + C * C + C + B * C)),
    )(img_re, img_im, p_re3, p_im3, wt, b2)

    # ------------- phase 2: out = text * gate (HBM-bound streaming) ------------------
    # Lane packing: fold `pack` consecutive text rows into one lane-dense row of width
    # CL = lcm(C, 128) (gate tiled `pack` times) so every store is a full-width vst,
    # for any C.  T is padded to a multiple of `pack` only when necessary.
    CL = (C * 128) // math.gcd(C, 128)             # lcm(C, 128)
    pack = CL // C
    Tp = ((T + pack - 1) // pack) * pack
    text_padded = text
    if Tp != T:
        # TODO(synk): this pad costs one extra HBM copy of `text`; only hit when
        # T % pack != 0 (the common aligned case keeps the reshape free).
        text_padded = jnp.pad(text, ((0, 0), (0, Tp - T), (0, 0)))
    TP = Tp // pack

    gate_l = gate if pack == 1 else jnp.tile(gate, (1, pack))    # (B, CL)
    text_p = text_padded.reshape(B, TP, CL)                      # contiguous merge: free

    # T-tile: largest lane-dense tile within the generation budget, preferring an
    # 8-aligned divisor of TP so there is no ragged (masked) tail tile.
    TT = max(1, min(TP, tile_budget_bytes // (CL * 4)))
    if TT < TP:
        TT = max(8, (TT // 8) * 8)                 # sublane alignment for partial tiles
        if TT >= TP:
            TT = TP
        elif TP % TT != 0:
            for cand in range(TT, 7, -8):          # nearest 8-aligned divisor of TP
                if TP % cand == 0:
                    TT = cand
                    break
            # else: keep 8-aligned TT and accept one masked tail tile per batch row
    n_t = pl.cdiv(TP, TT)

    out_p = pl.pallas_call(
        functools.partial(_apply_gate_kernel, n_t),
        out_shape=jax.ShapeDtypeStruct((B, TP, CL), jnp.float32),
        grid_spec=pltpu.PrefetchScalarGridSpec(
            num_scalar_prefetch=0,
            # Single flattened parallel axis -> balanced 2-TC split on v7x even for B=1.
            grid=(B * n_t,),
            in_specs=[
                pl.BlockSpec((B, CL), lambda i: (0, 0)),                      # gate: resident
                pl.BlockSpec((pl.Squeezed(), TT, CL),
                             lambda i: (i // n_t, i % n_t, 0)),               # text
            ],
            out_specs=pl.BlockSpec((pl.Squeezed(), TT, CL),
                                   lambda i: (i // n_t, i % n_t, 0)),
        ),
        compiler_params=pltpu.CompilerParams(
            dimension_semantics=("parallel",),
            vmem_limit_bytes=vmem_limit_bytes),
        cost_estimate=pl.CostEstimate(
            flops=B * Tp * C,
            transcendentals=0,
            bytes_accessed=4 * (2 * B * Tp * C + B * CL)),
    )(gate_l, text_p)

    out = out_p.reshape(B, Tp, C)
    if Tp != T:
        out = out[:, :T, :]
    return out


def _reference(text, img_re, img_im, p_re, p_im, conv_w, conv_b):
    real = img_re * p_re[None] - img_im * p_im[None]         # (B, N, C)
    pooled = jnp.mean(real, axis=1)                          # (B, C)
    gate = pooled @ conv_w.T + conv_b                        # (B, C)
    return text * gate[:, None, :]                           # (B, T, C)


if __name__ == "__main__":
    # Small shapes: B=2, n=N=8 (image tokens), T=8 (text tokens), d_model=C=32.
    B, N, T, C = 2, 8, 8, 32
    key = jax.random.PRNGKey(0)
    ks = jax.random.split(key, 7)

    text = jax.random.normal(ks[0], (B, T, C), dtype=jnp.float32)
    # Complex "image" (e.g. post-FFT features) represented as real + imag parts.
    img_re = jax.random.normal(ks[1], (B, N, C), dtype=jnp.float32)
    img_im = jax.random.normal(ks[2], (B, N, C), dtype=jnp.float32)

    # select_para ~ randn(n, d_model, 2)  -> split into real/imag planes.
    p_re = jax.random.normal(ks[3], (N, C), dtype=jnp.float32)
    p_im = jax.random.normal(ks[4], (N, C), dtype=jnp.float32)
    # Conv1d(d_model, d_model, kernel_size=1): weight (C, C, 1) -> (C, C), bias (C,).
    bound = 1.0 / jnp.sqrt(jnp.float32(C))
    conv_w = jax.random.uniform(ks[5], (C, C), jnp.float32, -bound, bound)
    conv_b = jax.random.uniform(ks[6], (C,), jnp.float32, -bound, bound)

    out = text_frequency_selection(text, img_re, img_im, p_re, p_im, conv_w, conv_b)
    out = jax.block_until_ready(out)

    ref = _reference(text, img_re, img_im, p_re, p_im, conv_w, conv_b)
    assert out.shape == (B, T, C)
    assert jnp.allclose(out, ref, atol=1e-5, rtol=1e-5), "mismatch vs reference"

    print("KERNEL_OK")
</pallas_src>

<mosaic_0001>
module attributes {stable_mosaic.version = 11 : i64} {
  func.func @_gate_kernel(%arg0: i32, %arg1: memref<2x8x32xf32, #tpu.memory_space<vmem>>, %arg2: memref<2x8x32xf32, #tpu.memory_space<vmem>>, %arg3: memref<1x8x32xf32, #tpu.memory_space<vmem>>, %arg4: memref<1x8x32xf32, #tpu.memory_space<vmem>>, %arg5: memref<32x32xf32, #tpu.memory_space<vmem>>, %arg6: memref<1x32xf32, #tpu.memory_space<vmem>>, %arg7: memref<2x32xf32, #tpu.memory_space<vmem>>) attributes {dimension_semantics = [#tpu.dimension_semantics<parallel>], iteration_bounds = array<i64: 1>, scalar_prefetch = 0 : i64, scratch_operands = 0 : i64, tpu.core_type = #tpu.core_type<tc>, window_params = [{transform_indices = @transform_0, window_bounds = array<i64: 2, 8, 32>}, {transform_indices = @transform_1, window_bounds = array<i64: 2, 8, 32>}, {pipeline_mode = #tpu.pipeline_mode<synchronous>, transform_indices = @transform_2, window_bounds = array<i64: 1, 8, 32>}, {pipeline_mode = #tpu.pipeline_mode<synchronous>, transform_indices = @transform_3, window_bounds = array<i64: 1, 8, 32>}, {pipeline_mode = #tpu.pipeline_mode<synchronous>, transform_indices = @transform_4, window_bounds = array<i64: 32, 32>}, {pipeline_mode = #tpu.pipeline_mode<synchronous>, transform_indices = @transform_5, window_bounds = array<i64: 1, 32>}, {transform_indices = @transform_6, window_bounds = array<i64: 2, 32>}]} {
    %c0 = arith.constant 0 : index
    %c0_0 = arith.constant 0 : index
    %c0_1 = arith.constant 0 : index
    %0 = vector.load %arg1[%c0, %c0_0, %c0_1] : memref<2x8x32xf32, #tpu.memory_space<vmem>>, vector<2x8x32xf32>
    %c0_2 = arith.constant 0 : index
    %c0_3 = arith.constant 0 : index
    %c0_4 = arith.constant 0 : index
    %1 = vector.load %arg3[%c0_2, %c0_3, %c0_4] : memref<1x8x32xf32, #tpu.memory_space<vmem>>, vector<1x8x32xf32>
    %2 = vector.broadcast %1 : vector<1x8x32xf32> to vector<2x8x32xf32>
    %3 = arith.mulf %0, %2 : vector<2x8x32xf32>
    %c0_5 = arith.constant 0 : index
    %c0_6 = arith.constant 0 : index
    %c0_7 = arith.constant 0 : index
    %4 = vector.load %arg2[%c0_5, %c0_6, %c0_7] : memref<2x8x32xf32, #tpu.memory_space<vmem>>, vector<2x8x32xf32>
    %c0_8 = arith.constant 0 : index
    %c0_9 = arith.constant 0 : index
    %c0_10 = arith.constant 0 : index
    %5 = vector.load %arg4[%c0_8, %c0_9, %c0_10] : memref<1x8x32xf32, #tpu.memory_space<vmem>>, vector<1x8x32xf32>
    %6 = vector.broadcast %5 : vector<1x8x32xf32> to vector<2x8x32xf32>
    %7 = arith.mulf %4, %6 : vector<2x8x32xf32>
    %8 = arith.subf %3, %7 : vector<2x8x32xf32>
    %cst = arith.constant dense<0.000000e+00> : vector<2x32xf32>
    %9 = vector.multi_reduction <add>, %8, %cst [1] : vector<2x8x32xf32> to vector<2x32xf32>
    %cst_11 = arith.constant 8.000000e+00 : f32
    %10 = vector.broadcast %cst_11 : f32 to vector<2x32xf32>
    %11 = arith.divf %9, %10 : vector<2x32xf32>
    %c0_12 = arith.constant 0 : index
    %c0_13 = arith.constant 0 : index
    %12 = vector.load %arg5[%c0_12, %c0_13] : memref<32x32xf32, #tpu.memory_space<vmem>>, vector<32x32xf32>
    %cst_14 = arith.constant dense<0.000000e+00> : vector<2x32xf32>
    %13 = tpu.matmul %11, %12, %cst_14 {dimension_numbers = #tpu.dot_dimension_numbers<[1], [0], [0], [1], [0, 0, 1, 1], [], []>} : vector<2x32xf32>, vector<32x32xf32>, vector<2x32xf32> -> vector<2x32xf32>
    %c0_15 = arith.constant 0 : index
    %c0_16 = arith.constant 0 : index
    %14 = vector.load %arg6[%c0_15, %c0_16] : memref<1x32xf32, #tpu.memory_space<vmem>>, vector<1x32xf32>
    %15 = vector.broadcast %14 : vector<1x32xf32> to vector<2x32xf32>
    %16 = arith.addf %13, %15 : vector<2x32xf32>
    %c0_17 = arith.constant 0 : index
    %c0_18 = arith.constant 0 : index
    %17 = vector.load %arg7[%c0_17, %c0_18] : memref<2x32xf32, #tpu.memory_space<vmem>>, vector<2x32xf32>
    tpu.vector_store %arg7[%c0_17, %c0_18], %16 {strides = array<i32>} : memref<2x32xf32, #tpu.memory_space<vmem>>, vector<2x32xf32>,
    return
  }
  func.func @transform_0(%arg0: i32) -> (i32, i32, i32) {
    %c0_i32 = arith.constant 0 : i32
    %c0_i32_0 = arith.constant 0 : i32
    %c0_i32_1 = arith.constant 0 : i32
    return %arg0, %c0_i32, %c0_i32_0 : i32, i32, i32
  }
  func.func @transform_1(%arg0: i32) -> (i32, i32, i32) {
    %c0_i32 = arith.constant 0 : i32
    %c0_i32_0 = arith.constant 0 : i32
    %c0_i32_1 = arith.constant 0 : i32
    return %arg0, %c0_i32, %c0_i32_0 : i32, i32, i32
  }
  func.func @transform_2(%arg0: i32) -> (i32, i32, i32) {
    %c0_i32 = arith.constant 0 : i32
    %c0_i32_0 = arith.constant 0 : i32
    %c0_i32_1 = arith.constant 0 : i32
    %c0_i32_2 = arith.constant 0 : i32
    return %c0_i32, %c0_i32_0, %c0_i32_1 : i32, i32, i32
  }
  func.func @transform_3(%arg0: i32) -> (i32, i32, i32) {
    %c0_i32 = arith.constant 0 : i32
    %c0_i32_0 = arith.constant 0 : i32
    %c0_i32_1 = arith.constant 0 : i32
    %c0_i32_2 = arith.constant 0 : i32
    return %c0_i32, %c0_i32_0, %c0_i32_1 : i32, i32, i32
  }
  func.func @transform_4(%arg0: i32) -> (i32, i32) {
    %c0_i32 = arith.constant 0 : i32
    %c0_i32_0 = arith.constant 0 : i32
    %c0_i32_1 = arith.constant 0 : i32
    return %c0_i32, %c0_i32_0 : i32, i32
  }
  func.func @transform_5(%arg0: i32) -> (i32, i32) {
    %c0_i32 = arith.constant 0 : i32
    %c0_i32_0 = arith.constant 0 : i32
    %c0_i32_1 = arith.constant 0 : i32
    return %c0_i32, %c0_i32_0 : i32, i32
  }
  func.func @transform_6(%arg0: i32) -> (i32, i32) {
    %c0_i32 = arith.constant 0 : i32
    %c0_i32_0 = arith.constant 0 : i32
    return %arg0, %c0_i32 : i32, i32
  }
}

</mosaic_0001>

<bundles_post_ra>
// kernel: tpu_custom_call.1
= control target key start
LH: loop header
LB: loop body
LE: loop exit
PB: predicated region body
PF: predicated region fallthrough
CT: control target
= control target key end

     0   :  { %11 = vsyncpa [#allocation3], 0  ;;  %s502_s0 = inlined_call_operand.hbm [shape: f32[2,8,32], index: 0, kind: input, shape index: {}]   ;;  %s503_s1 = inlined_call_operand.hbm [shape: f32[2,8,32], index: 1, kind: input, shape index: {}]   ;;  %s504_s2 = inlined_call_operand.hbm [shape: f32[1,8,32], index: 2, kind: input, shape index: {}]   ;;  %s505_s3 = inlined_call_operand.vmem [shape: f32[1,8,32], index: 3, kind: input, shape index: {}]   ;;  %s506_s4 = inlined_call_operand.hbm [shape: f32[32,32], index: 4, kind: input, shape index: {}]   ;;  %s507_s5 = inlined_call_operand.vmem [shape: f32[1,32], index: 5, kind: input, shape index: {}]   ;;  %s508_s6 = inlined_call_operand.hbm [shape: f32[2,32], index: 6, kind: output, shape index: {}]  }
   0x1   :  { %12 = vsyncpa [#allocation6], 0 }
   0x2   :  { %13 = vsyncpa [#allocation9], 0 }
   0x3   :  { %14 = vsyncpa [#allocation4], 0  ;;  %s365_s21 = smov [#allocation5]   ;;  %s366_s23 = smov [#allocation2]  }
   0x4   :  { %s32_s22 = sshll.u32 %s365_s21, 4  ;;  %s20_s24 = sshll.u32 %s366_s23, 4  ;;  %s33_s22 = int_to_ptr.vmem [resolvable:$true] %s32_s22  ;;  %s410_s24 = int_to_ptr.vmem [resolvable:$true] %s20_s24 }
   0x5   :  { %s247_s27 = scalar_lea.hbm %s503_s1, 256 }
   0x6   :  { %p248_p0 = scmp.ne.s32.totalorder %s503_s1, %s247_s27  ;;  %p251_p1 = scmp.lt.u32.totalorder %s247_s27, %s503_s1 }
   0x8   :  { %p253_p2 = pnand %p251_p1, %p248_p0 }
   0xa   :  { %256 = shalt.err (!%p253_p2)
}
   0xb   :  { %s257_s8 = scalar_lea.vmem %s33_s22, 256  ;;  %p262_p4 = scmp.lt.s32.totalorder %s33_s22, %s33_s22 }
   0xc   :  { %p258_p3 = scmp.ne.s32.totalorder %s33_s22, %s257_s8  ;;  %p263_p5 = scmp.lt.s32.totalorder %s257_s8, %s257_s8 }
   0xe   :  { %p264_p6 = por %p263_p5, %p262_p4 }
  0x10   :  { %p265_p7 = pnand %p264_p6, %p258_p3 }
  0x12   :  { %268 = shalt.err (!%p265_p7)
}
  0x13   :  { %s367_s9 = smov 128   ;;  %s368_s10 = smov 8  }
  0x14   :  { %38 = dma.hbm_to_vmem [thread:$0]  %s503_s1, 256, %s33_s22, [#allocation6], %s367_s9, %s367_s9, %s368_s10  }
  0x15   :  { %s269_s15 = scalar_lea.hbm %s502_s0, 256 }
  0x16   :  { %p270_p8 = scmp.ne.s32.totalorder %s502_s0, %s269_s15  ;;  %p273_p9 = scmp.lt.u32.totalorder %s269_s15, %s502_s0 }
  0x18   :  { %p275_p10 = pnand %p273_p9, %p270_p8 }
  0x1a   :  { %278 = shalt.err (!%p275_p10)
}
  0x1b   :  { %s279_s20 = scalar_lea.vmem %s410_s24, 256  ;;  %p284_p12 = scmp.lt.s32.totalorder %s410_s24, %s410_s24 }
  0x1c   :  { %p280_p11 = scmp.ne.s32.totalorder %s410_s24, %s279_s20  ;;  %p285_p13 = scmp.lt.s32.totalorder %s279_s20, %s279_s20 }
  0x1e   :  { %p286_p0 = por %p285_p13, %p284_p12 }
  0x20   :  { %p287_p1 = pnand %p286_p0, %p280_p11 }
  0x22   :  { %290 = shalt.err (!%p287_p1)
}
  0x23   :  { %26 = dma.hbm_to_vmem [thread:$0]  %s502_s0, 256, %s410_s24, [#allocation3], %s367_s9, %s367_s9, %s368_s10  }
  0x24   :  { %s369_s22 = smov [#allocation7]   ;;  %s370_s25 = smov [#allocation8]  }
  0x25   :  { %s45_s23 = sshll.u32 %s369_s22, 4  ;;  %s56_s26 = sshll.u32 %s370_s25, 4  ;;  %s46_s23 = int_to_ptr.vmem [resolvable:$true] %s45_s23  ;;  %s447_s26 = int_to_ptr.vmem [resolvable:$true] %s56_s26 }
  0x26   :  { %s291_s29 = scalar_lea.hbm %s504_s2, 128 }
  0x27   :  { %p292_p2 = scmp.ne.s32.totalorder %s504_s2, %s291_s29  ;;  %p295_p3 = scmp.lt.u32.totalorder %s291_s29, %s504_s2 }
  0x29   :  { %p297_p4 = pnand %p295_p3, %p292_p2 }
  0x2b   :  { %300 = shalt.err (!%p297_p4)
}
  0x2c   :  { %s301_s0 = scalar_lea.vmem %s46_s23, 128  ;;  %p306_p6 = scmp.lt.s32.totalorder %s46_s23, %s46_s23 }
  0x2d   :  { %p302_p5 = scmp.ne.s32.totalorder %s46_s23, %s301_s0  ;;  %p307_p7 = scmp.lt.s32.totalorder %s301_s0, %s301_s0 }
  0x2f   :  { %p308_p8 = por %p307_p7, %p306_p6 }
  0x31   :  { %p309_p9 = pnand %p308_p8, %p302_p5 }
  0x33   :  { %312 = shalt.err (!%p309_p9)
}
  0x34   :  { %48 = dma.hbm_to_vmem [thread:$0]  %s504_s2, 128, %s46_s23, [#allocation6]  }
  0x35   :  { %s313_s15 = scalar_lea.hbm %s506_s4, 512 }
  0x36   :  { %p314_p10 = scmp.ne.s32.totalorder %s506_s4, %s313_s15  ;;  %p317_p11 = scmp.lt.u32.totalorder %s313_s15, %s506_s4 }
  0x38   :  { %p319_p12 = pnand %p317_p11, %p314_p10 }
  0x3a   :  { %322 = shalt.err (!%p319_p12)
}
  0x3b   :  { %s323_s20 = scalar_lea.vmem %s447_s26, 512  ;;  %p328_p0 = scmp.lt.s32.totalorder %s447_s26, %s447_s26 }
  0x3c   :  { %p324_p13 = scmp.ne.s32.totalorder %s447_s26, %s323_s20  ;;  %p329_p1 = scmp.lt.s32.totalorder %s323_s20, %s323_s20 }
  0x3e   :  { %p330_p2 = por %p329_p1, %p328_p0 }
  0x40   :  { %p331_p3 = pnand %p330_p2, %p324_p13 }
  0x42   :  { %334 = shalt.err (!%p331_p3)
}
  0x43   :  { %62 = dma.hbm_to_vmem [thread:$0]  %s506_s4, 512, %s447_s26, [#allocation9], %s367_s9, %s367_s9, %s368_s10  }
  0x44   :  { %357 = dma.done.wait [#allocation3], 256  }
  0x45   :  { %358 = vsyncadd [#allocation3], 4294967040 }
  0x46   :  { %359 = dma.done.wait [#allocation6], 384  }
  0x47   :  { %360 = vsyncadd [#allocation6], 4294966912 }
  0x48   :  { %361 = dma.done.wait [#allocation9], 512  }
  0x49   :  { %362 = vsyncadd [#allocation9], 4294966784  ;;  %v371_v0 = vmov 0.0|0.0   ;;  %vm372_vm0 = vmmov 0   ;;  %v373_v1 = vmov 0.0   ;;  %v107_v2 = vld [vmem:[#allocation8] sm:$0xff] }
  0x4a   :  { %231 = vmatprep.subr.bf16.mxu0 %v371_v0  ;;  %228 = vmatprep.mubr.msk.f32.mxu0 %vm372_vm0, %v373_v1  ;;  %v108_v3 = vld [vmem:[#allocation8 + $0x8] sm:$0xff]  ;;  %v109_v4 = vld [vmem:[#allocation8 + $0x10] sm:$0xff]  ;;  %v110_v6 = vld [vmem:[#allocation8 + $0x18] sm:$0xff]  ;;  %vm89_vm1 = vcmask 261120   ;;  %vm120_vm2 = vcmask 1041409   ;;  %s374_s21 = smov [#allocation10]  }
  0x4b   :  { %v232_v5 = vpack.c.bf16 %v108_v3, %v107_v2  ;;  %v77_v7 = vld [vmem:[#allocation2] sm:$0xff]  ;;  %v78_v8 = vld [vmem:[#allocation2 + $0x8] sm:$0xff]  ;;  %v82_v10 = vld [vmem:[#allocation5] sm:$0xff]  ;;  %v235_v12 = vpack.c.bf16 %v110_v6, %v109_v4  ;;  %s202_s22 = sshll.u32 %s374_s21, 4  ;;  %vm194_vm3 = vcmask 254976   ;;  %s203_s22 = int_to_ptr.vmem [resolvable:$true] %s202_s22 }
  0x4c   :  { %v79_v9 = vld [vmem:[#allocation7] sm:$0xff]  ;;  %v83_v11 = vld [vmem:[#allocation5 + $0x8] sm:$0xff]  ;;  %s335_s23 = scalar_lea.vmem %s203_s22, 32  ;;  %p340_p5 = scmp.lt.s32.totalorder %s203_s22, %s203_s22 }
  0x4d   :  { %233 = vmatpush3.bf16.msra.mxu0 %v232_v5  ;;  %v80_v13 = vmul.f32 %v79_v9, %v77_v7  ;;  %v81_v14 = vmul.f32 %v79_v9, %v78_v8  ;;  %v84_v15 = vld [vmem:[%s505_s3] sm:$0xff]  ;;  %p336_p4 = scmp.ne.s32.totalorder %s203_s22, %s335_s23  ;;  %p341_p6 = scmp.lt.s32.totalorder %s335_s23, %s335_s23 }
  0x4e   :  { %234 = vmatprep.subr.bf16.mxu0 %v371_v0  ;;  %v85_v16 = vmul.f32 %v84_v15, %v82_v10  ;;  %v86_v17 = vmul.f32 %v84_v15, %v83_v11  ;;  %v213_v37 = vld [vmem:[%s507_s5] ss:$0 sm:$0xff] }
  0x4f   :  { %p342_p7 = por %p341_p6, %p340_p5 }
  0x50   :  { %v87_v18 = vsub.f32 %v80_v13, %v85_v16  ;;  %v88_v19 = vsub.f32 %v81_v14, %v86_v17 }
  0x51   :  { %236 = vmatpush3.bf16.msra.mxu0 %v235_v12  ;;  %p343_p8 = pnand %p342_p7, %p336_p4 }
  0x52   :  { %v90_v20 = vsel %vm89_vm1, %v87_v18, 0.0  ;;  %v97_v21 = vsel %vm89_vm1, %v88_v19, 0.0 }
  0x53   :  { %v91_v22 = vrot.slane %v90_v20, 4  ;;  %v98_v23 = vrot.slane %v97_v21, 4 }
  0x55   :  { %v92_v24 = vadd.f32 %v91_v22, %v90_v20  ;;  %v99_v25 = vadd.f32 %v98_v23, %v97_v21 }
  0x57   :  { %v93_v26 = vrot.slane %v92_v24, 2  ;;  %v100_v27 = vrot.slane %v99_v25, 2 }
  0x59   :  { %v94_v28 = vadd.f32 %v93_v26, %v92_v24  ;;  %v101_v29 = vadd.f32 %v100_v27, %v99_v25 }
  0x5b   :  { %v95_v30 = vrot.slane %v94_v28, 1  ;;  %v102_v31 = vrot.slane %v101_v29, 1 }
  0x5d   :  { %v96_v32 = vadd.f32 %v95_v30, %v94_v28  ;;  %v103_v33 = vadd.f32 %v102_v31, %v101_v29 }
  0x5f   :  { %v105_v34 = vmul.f32 0.125, %v96_v32  ;;  %v106_v35 = vmul.f32 0.125, %v103_v33 }
  0x61   :  { %v121_v36 = vsel %vm120_vm2, %v106_v35, %v105_v34 }
  0x62   :  { %229 = vmatmul.mubr.msk.f32.vlgmr.msra.gmra.mrb[0].mxu0 %vm89_vm1, %v121_v36 }
 0x135   :  { %v190_v38 = vpop.f32.mrb[0].mxu0 }
 0x136   :  { %v191_v39 = vadd.f32 %v213_v37, %v190_v38  ;;  %v230_v40 = vpop.f32.mrb[1].mxu0 }
 0x138   :  { %195 = vst.msk [vmem:[#allocation10] sm:$0x3] %vm194_vm3, %v191_v39 }
 0x139   :  { %346 = shalt.err (!%p343_p8)
}
 0x13a   :  { %s347_s27 = scalar_lea.hbm %s508_s6, 32 }
 0x13b   :  { %p348_p9 = scmp.ne.s32.totalorder %s508_s6, %s347_s27  ;;  %p351_p10 = scmp.lt.u32.totalorder %s347_s27, %s508_s6 }
 0x13d   :  { %p353_p11 = pnand %p351_p10, %p348_p9 }
 0x13f   :  { %356 = shalt.err (!%p353_p11)
}
 0x140   :  { %205 = dma.vmem_to_hbm [thread:$0]  %s203_s22, 32, %s508_s6, [#allocation4]  }
 0x141   :  { %363 = dma.done.wait [#allocation4], 32  }
 0x142   :  { %364 = vsyncadd [#allocation4], 4294967264 }
 0x143   :  { %209 = vsyncpa [#allocation3], 1 }
 0x144   :  { %210 = vsyncpa [#allocation6], 1 }
 0x145   :  { %211 = vsyncpa [#allocation9], 1 }
 0x146   :  { %212 = vsyncpa [#allocation4], 1 }

</bundles_post_ra>
